<compile_context>
chip_gen: v7x
topology: tpu7x:2x2x1
jax: 0.10.0
libtpu: 0.0.40
codegen_flags: <defaults>
</compile_context>

<pallas_src>
import jax
import jax.numpy as jnp
from jax.experimental import pallas as pl
from jax.experimental.pallas import tpu as pltpu


def _round_up(x, m):
    return (x + m - 1) // m * m


def _critic_kernel(x_ref,
                   w1_ref, b1_ref,
                   w2_ref, b2_ref,
                   w3_ref, b3_ref,
                   w4_ref, b4_ref,
                   o_ref):
    """One (TB, state_dim) batch tile -> (TB, 1) values.  Weights are VMEM-resident."""
    x = x_ref[...]

    # Layer 1: Linear + ReLU (f32 accumulation on the MXU, f32 epilogue on the VPU).
    h = jnp.dot(x, w1_ref[...], preferred_element_type=jnp.float32) + b1_ref[...]
    h = jnp.maximum(h, 0.0)

    # Layer 2: Linear + ReLU.
    h = jnp.dot(h.astype(w2_ref.dtype), w2_ref[...],
                preferred_element_type=jnp.float32) + b2_ref[...]
    h = jnp.maximum(h, 0.0)

    # Layer 3: Linear + Hardswish  (x * relu6(x + 3) / 6), epilogue in f32.
    z = jnp.dot(h.astype(w3_ref.dtype), w3_ref[...],
                preferred_element_type=jnp.float32) + b3_ref[...]
    h = z * jnp.clip(z + 3.0, 0.0, 6.0) * (1.0 / 6.0)

    # Layer 4 (out_dim = 1): VPU multiply + lane reduction instead of an MXU
    # matmul with a single output column.  w4_ref is a (1, mid) f32 row.
    o_ref[...] = jnp.sum(h * w4_ref[...], axis=-1, keepdims=True) + b4_ref[...]


def critic_adv_forward(state, params, *, compute_dtype=jnp.bfloat16,
                       block_rows=1024):
    """state: (B, state_dim) f32.  params: dict of weights/biases.  -> (B, 1) f32.

    compute_dtype: dtype used for the MXU operands (state, W1..W3).  Use
    jnp.float32 for bit-faithful results, jnp.bfloat16 for lower HBM traffic.
    """
    B, state_dim = state.shape
    mid = params["w1"].shape[1]

    # Batch tile: as large as reasonable (multiples of 8), capped by block_rows.
    TB = min(block_rows, _round_up(B, 8))
    B_pad = _round_up(B, TB)

    x = state.astype(compute_dtype)
    if B_pad != B:
        x = jnp.pad(x, ((0, B_pad - B), (0, 0)))

    # Matmul operands in compute_dtype; biases and the final (VPU) layer in f32.
    w1 = params["w1"].astype(compute_dtype)
    w2 = params["w2"].astype(compute_dtype)
    w3 = params["w3"].astype(compute_dtype)
    w4 = params["w4"].astype(jnp.float32)            # (1, mid) row
    b1 = params["b1"].astype(jnp.float32)
    b2 = params["b2"].astype(jnp.float32)
    b3 = params["b3"].astype(jnp.float32)
    b4 = params["b4"].astype(jnp.float32)            # (1, 1)

    grid = (pl.cdiv(B_pad, TB),)
    const = lambda i: (0, 0)                         # weights: fetched once, stay resident
    in_specs = [
        pl.BlockSpec((TB, state_dim), lambda i: (i, 0)),   # streamed batch tile
        pl.BlockSpec(w1.shape, const), pl.BlockSpec(b1.shape, const),
        pl.BlockSpec(w2.shape, const), pl.BlockSpec(b2.shape, const),
        pl.BlockSpec(w3.shape, const), pl.BlockSpec(b3.shape, const),
        pl.BlockSpec(w4.shape, const), pl.BlockSpec(b4.shape, const),
    ]
    out_specs = pl.BlockSpec((TB, 1), lambda i: (i, 0))

    # Explicit VMEM budget: double-buffered input/output tiles + resident
    # weights + live activations, with headroom.  Capped well under v7x's
    # 64 MiB physical VMEM.
    in_item = jnp.dtype(compute_dtype).itemsize
    weight_bytes = sum(int(a.size) * a.dtype.itemsize
                       for a in (w1, b1, w2, b2, w3, b3, w4, b4))
    vmem_bytes = (2 * TB * state_dim * in_item       # double-buffered state tile
                  + 2 * TB * 4                       # double-buffered output tile
                  + weight_bytes
                  + 6 * TB * mid * 4)                # activation / spill headroom
    vmem_limit = min(_round_up(vmem_bytes + (4 << 20), 1 << 20), 48 << 20)

    flops = 2 * B_pad * (state_dim * mid + mid * mid + mid * mid + mid)
    bytes_accessed = (int(x.size) * in_item + weight_bytes + B_pad * 4)
    cost = pl.CostEstimate(flops=flops, transcendentals=0,
                           bytes_accessed=bytes_accessed)

    out = pl.pallas_call(
        _critic_kernel,
        grid=grid,
        in_specs=in_specs,
        out_specs=out_specs,
        out_shape=jax.ShapeDtypeStruct((B_pad, 1), jnp.float32),
        compiler_params=pltpu.CompilerParams(
            dimension_semantics=("parallel",),       # megacore shard on v7x
            vmem_limit_bytes=int(vmem_limit)),
        cost_estimate=cost,
    )(x, w1, b1, w2, b2, w3, b3, w4, b4)

    return out[:B]


def init_params(key, state_dim, mid_dim):
    """Deterministic init mimicking torch.nn.Linear (U(-1/sqrt(fan_in), ...)).

    W1..W3 stored as (in_dim, out_dim); W4 stored as a (1, mid) row (same data
    layout as torch's Linear(mid, 1).weight); biases as (1, out_dim)."""
    def linear(k, fan_in, fan_out):
        kw, kb = jax.random.split(k)
        bound = 1.0 / (fan_in ** 0.5)
        w = jax.random.uniform(kw, (fan_in, fan_out), jnp.float32, -bound, bound)
        b = jax.random.uniform(kb, (1, fan_out), jnp.float32, -bound, bound)
        return w, b

    k1, k2, k3, k4 = jax.random.split(key, 4)
    w1, b1 = linear(k1, state_dim, mid_dim)
    w2, b2 = linear(k2, mid_dim, mid_dim)
    w3, b3 = linear(k3, mid_dim, mid_dim)
    w4_col, b4 = linear(k4, mid_dim, 1)
    w4 = w4_col.reshape(1, mid_dim)
    b4 = b4.reshape(1, 1)
    return dict(w1=w1, b1=b1, w2=w2, b2=b2, w3=w3, b3=b3, w4=w4, b4=b4)


def _reference(state, p):
    """Pure-JAX f32 reference for correctness checks."""
    h = jnp.maximum(state @ p["w1"] + p["b1"], 0.0)
    h = jnp.maximum(h @ p["w2"] + p["b2"], 0.0)
    z = h @ p["w3"] + p["b3"]
    h = z * jnp.clip(z + 3.0, 0.0, 6.0) / 6.0
    return jnp.sum(h * p["w4"], axis=-1, keepdims=True) + p["b4"]


if __name__ == "__main__":
    B, STATE_DIM, MID_DIM = 8, 16, 32

    key = jax.random.PRNGKey(0)
    k_params, k_state = jax.random.split(key)
    params = init_params(k_params, STATE_DIM, MID_DIM)
    state = jax.random.normal(k_state, (B, STATE_DIM), jnp.float32)

    ref = _reference(state, params)

    # f32 path: bit-faithful to the PyTorch module.
    out_f32 = critic_adv_forward(state, params, compute_dtype=jnp.float32)
    out_f32 = jax.block_until_ready(out_f32)
    assert out_f32.shape == (B, 1)
    assert jnp.allclose(out_f32, ref, atol=1e-5, rtol=1e-5), "f32 mismatch vs reference"

    # bf16-operand path (default, for v6e/v7x HBM savings): looser tolerance.
    out_bf16 = critic_adv_forward(state, params)  # compute_dtype=bfloat16
    out_bf16 = jax.block_until_ready(out_bf16)
    assert out_bf16.shape == (B, 1)
    assert jnp.allclose(out_bf16, ref, atol=5e-2, rtol=5e-2), "bf16 mismatch vs reference"

    print("KERNEL_OK")
</pallas_src>

<mosaic_0001>
module attributes {stable_mosaic.version = 11 : i64} {
  func.func @_critic_kernel(%arg0: i32, %arg1: memref<8x16xf32, #tpu.memory_space<vmem>>, %arg2: memref<16x32xf32, #tpu.memory_space<vmem>>, %arg3: memref<1x32xf32, #tpu.memory_space<vmem>>, %arg4: memref<32x32xf32, #tpu.memory_space<vmem>>, %arg5: memref<1x32xf32, #tpu.memory_space<vmem>>, %arg6: memref<32x32xf32, #tpu.memory_space<vmem>>, %arg7: memref<1x32xf32, #tpu.memory_space<vmem>>, %arg8: memref<1x32xf32, #tpu.memory_space<vmem>>, %arg9: memref<1x1xf32, #tpu.memory_space<vmem>>, %arg10: memref<8x1xf32, #tpu.memory_space<vmem>>) attributes {dimension_semantics = [#tpu.dimension_semantics<parallel>], iteration_bounds = array<i64: 1>, scalar_prefetch = 0 : i64, scratch_operands = 0 : i64, tpu.core_type = #tpu.core_type<tc>, window_params = [{transform_indices = @transform_0, window_bounds = array<i64: 8, 16>}, {pipeline_mode = #tpu.pipeline_mode<synchronous>, transform_indices = @transform_1, window_bounds = array<i64: 16, 32>}, {pipeline_mode = #tpu.pipeline_mode<synchronous>, transform_indices = @transform_2, window_bounds = array<i64: 1, 32>}, {pipeline_mode = #tpu.pipeline_mode<synchronous>, transform_indices = @transform_3, window_bounds = array<i64: 32, 32>}, {pipeline_mode = #tpu.pipeline_mode<synchronous>, transform_indices = @transform_4, window_bounds = array<i64: 1, 32>}, {pipeline_mode = #tpu.pipeline_mode<synchronous>, transform_indices = @transform_5, window_bounds = array<i64: 32, 32>}, {pipeline_mode = #tpu.pipeline_mode<synchronous>, transform_indices = @transform_6, window_bounds = array<i64: 1, 32>}, {pipeline_mode = #tpu.pipeline_mode<synchronous>, transform_indices = @transform_7, window_bounds = array<i64: 1, 32>}, {pipeline_mode = #tpu.pipeline_mode<synchronous>, transform_indices = @transform_8, window_bounds = array<i64: 1, 1>}, {transform_indices = @transform_9, window_bounds = array<i64: 8, 1>}]} {
    %c0 = arith.constant 0 : index
    %c0_0 = arith.constant 0 : index
    %0 = vector.load %arg1[%c0, %c0_0] : memref<8x16xf32, #tpu.memory_space<vmem>>, vector<8x16xf32>
    %c0_1 = arith.constant 0 : index
    %c0_2 = arith.constant 0 : index
    %1 = vector.load %arg2[%c0_1, %c0_2] : memref<16x32xf32, #tpu.memory_space<vmem>>, vector<16x32xf32>
    %cst = arith.constant dense<0.000000e+00> : vector<8x32xf32>
    %2 = tpu.matmul %0, %1, %cst {dimension_numbers = #tpu.dot_dimension_numbers<[1], [0], [0], [1], [0, 0, 1, 1], [], []>} : vector<8x16xf32>, vector<16x32xf32>, vector<8x32xf32> -> vector<8x32xf32>
    %c0_3 = arith.constant 0 : index
    %c0_4 = arith.constant 0 : index
    %3 = vector.load %arg3[%c0_3, %c0_4] : memref<1x32xf32, #tpu.memory_space<vmem>>, vector<1x32xf32>
    %4 = vector.broadcast %3 : vector<1x32xf32> to vector<8x32xf32>
    %5 = arith.addf %2, %4 : vector<8x32xf32>
    %cst_5 = arith.constant 0.000000e+00 : f32
    %6 = vector.broadcast %cst_5 : f32 to vector<8x32xf32>
    %7 = arith.maximumf %5, %6 : vector<8x32xf32>
    %c0_6 = arith.constant 0 : index
    %c0_7 = arith.constant 0 : index
    %8 = vector.load %arg4[%c0_6, %c0_7] : memref<32x32xf32, #tpu.memory_space<vmem>>, vector<32x32xf32>
    %cst_8 = arith.constant dense<0.000000e+00> : vector<8x32xf32>
    %9 = tpu.matmul %7, %8, %cst_8 {dimension_numbers = #tpu.dot_dimension_numbers<[1], [0], [0], [1], [0, 0, 1, 1], [], []>} : vector<8x32xf32>, vector<32x32xf32>, vector<8x32xf32> -> vector<8x32xf32>
    %c0_9 = arith.constant 0 : index
    %c0_10 = arith.constant 0 : index
    %10 = vector.load %arg5[%c0_9, %c0_10] : memref<1x32xf32, #tpu.memory_space<vmem>>, vector<1x32xf32>
    %11 = vector.broadcast %10 : vector<1x32xf32> to vector<8x32xf32>
    %12 = arith.addf %9, %11 : vector<8x32xf32>
    %cst_11 = arith.constant 0.000000e+00 : f32
    %13 = vector.broadcast %cst_11 : f32 to vector<8x32xf32>
    %14 = arith.maximumf %12, %13 : vector<8x32xf32>
    %c0_12 = arith.constant 0 : index
    %c0_13 = arith.constant 0 : index
    %15 = vector.load %arg6[%c0_12, %c0_13] : memref<32x32xf32, #tpu.memory_space<vmem>>, vector<32x32xf32>
    %cst_14 = arith.constant dense<0.000000e+00> : vector<8x32xf32>
    %16 = tpu.matmul %14, %15, %cst_14 {dimension_numbers = #tpu.dot_dimension_numbers<[1], [0], [0], [1], [0, 0, 1, 1], [], []>} : vector<8x32xf32>, vector<32x32xf32>, vector<8x32xf32> -> vector<8x32xf32>
    %c0_15 = arith.constant 0 : index
    %c0_16 = arith.constant 0 : index
    %17 = vector.load %arg7[%c0_15, %c0_16] : memref<1x32xf32, #tpu.memory_space<vmem>>, vector<1x32xf32>
    %18 = vector.broadcast %17 : vector<1x32xf32> to vector<8x32xf32>
    %19 = arith.addf %16, %18 : vector<8x32xf32>
    %cst_17 = arith.constant 3.000000e+00 : f32
    %20 = vector.broadcast %cst_17 : f32 to vector<8x32xf32>
    %21 = arith.addf %19, %20 : vector<8x32xf32>
    %cst_18 = arith.constant 0.000000e+00 : f32
    %cst_19 = arith.constant 6.000000e+00 : f32
    %22 = vector.broadcast %cst_18 : f32 to vector<8x32xf32>
    %23 = arith.maximumf %22, %21 : vector<8x32xf32>
    %24 = vector.broadcast %cst_19 : f32 to vector<8x32xf32>
    %25 = arith.minimumf %24, %23 : vector<8x32xf32>
    %26 = arith.mulf %19, %25 : vector<8x32xf32>
    %cst_20 = arith.constant 0.166666672 : f32
    %27 = vector.broadcast %cst_20 : f32 to vector<8x32xf32>
    %28 = arith.mulf %26, %27 : vector<8x32xf32>
    %c0_21 = arith.constant 0 : index
    %c0_22 = arith.constant 0 : index
    %29 = vector.load %arg8[%c0_21, %c0_22] : memref<1x32xf32, #tpu.memory_space<vmem>>, vector<1x32xf32>
    %30 = vector.broadcast %29 : vector<1x32xf32> to vector<8x32xf32>
    %31 = arith.mulf %28, %30 : vector<8x32xf32>
    %cst_23 = arith.constant dense<0.000000e+00> : vector<8xf32>
    %32 = vector.multi_reduction <add>, %31, %cst_23 [1] : vector<8x32xf32> to vector<8xf32>
    %33 = vector.shape_cast %32 : vector<8xf32> to vector<8x1xf32>
    %c0_24 = arith.constant 0 : index
    %c0_25 = arith.constant 0 : index
    %34 = vector.load %arg9[%c0_24, %c0_25] : memref<1x1xf32, #tpu.memory_space<vmem>>, vector<1x1xf32>
    %35 = vector.broadcast %34 : vector<1x1xf32> to vector<8x1xf32>
    %36 = arith.addf %33, %35 : vector<8x1xf32>
    %c0_26 = arith.constant 0 : index
    %c0_27 = arith.constant 0 : index
    %37 = vector.load %arg10[%c0_26, %c0_27] : memref<8x1xf32, #tpu.memory_space<vmem>>, vector<8x1xf32>
    tpu.vector_store %arg10[%c0_26, %c0_27], %36 {strides = array<i32>} : memref<8x1xf32, #tpu.memory_space<vmem>>, vector<8x1xf32>,
    return
  }
  func.func @transform_0(%arg0: i32) -> (i32, i32) {
    %c0_i32 = arith.constant 0 : i32
    %c0_i32_0 = arith.constant 0 : i32
    return %arg0, %c0_i32 : i32, i32
  }
  func.func @transform_1(%arg0: i32) -> (i32, i32) {
    %c0_i32 = arith.constant 0 : i32
    %c0_i32_0 = arith.constant 0 : i32
    %c0_i32_1 = arith.constant 0 : i32
    return %c0_i32, %c0_i32_0 : i32, i32
  }
  func.func @transform_2(%arg0: i32) -> (i32, i32) {
    %c0_i32 = arith.constant 0 : i32
    %c0_i32_0 = arith.constant 0 : i32
    %c0_i32_1 = arith.constant 0 : i32
    return %c0_i32, %c0_i32_0 : i32, i32
  }
  func.func @transform_3(%arg0: i32) -> (i32, i32) {
    %c0_i32 = arith.constant 0 : i32
    %c0_i32_0 = arith.constant 0 : i32
    %c0_i32_1 = arith.constant 0 : i32
    return %c0_i32, %c0_i32_0 : i32, i32
  }
  func.func @transform_4(%arg0: i32) -> (i32, i32) {
    %c0_i32 = arith.constant 0 : i32
    %c0_i32_0 = arith.constant 0 : i32
    %c0_i32_1 = arith.constant 0 : i32
    return %c0_i32, %c0_i32_0 : i32, i32
  }
  func.func @transform_5(%arg0: i32) -> (i32, i32) {
    %c0_i32 = arith.constant 0 : i32
    %c0_i32_0 = arith.constant 0 : i32
    %c0_i32_1 = arith.constant 0 : i32
    return %c0_i32, %c0_i32_0 : i32, i32
  }
  func.func @transform_6(%arg0: i32) -> (i32, i32) {
    %c0_i32 = arith.constant 0 : i32
    %c0_i32_0 = arith.constant 0 : i32
    %c0_i32_1 = arith.constant 0 : i32
    return %c0_i32, %c0_i32_0 : i32, i32
  }
  func.func @transform_7(%arg0: i32) -> (i32, i32) {
    %c0_i32 = arith.constant 0 : i32
    %c0_i32_0 = arith.constant 0 : i32
    %c0_i32_1 = arith.constant 0 : i32
    return %c0_i32, %c0_i32_0 : i32, i32
  }
  func.func @transform_8(%arg0: i32) -> (i32, i32) {
    %c0_i32 = arith.constant 0 : i32
    %c0_i32_0 = arith.constant 0 : i32
    %c0_i32_1 = arith.constant 0 : i32
    return %c0_i32, %c0_i32_0 : i32, i32
  }
  func.func @transform_9(%arg0: i32) -> (i32, i32) {
    %c0_i32 = arith.constant 0 : i32
    %c0_i32_0 = arith.constant 0 : i32
    return %arg0, %c0_i32 : i32, i32
  }
}

</mosaic_0001>

<bundles_post_ra>
// kernel: tpu_custom_call.1
= control target key start
LH: loop header
LB: loop body
LE: loop exit
PB: predicated region body
PF: predicated region fallthrough
CT: control target
= control target key end

     0   :  { %s683_s0 = inlined_call_operand.hbm [shape: f32[8,16], index: 0, kind: input, shape index: {}]   ;;  %s684_s1 = inlined_call_operand.hbm [shape: f32[16,32], index: 1, kind: input, shape index: {}]   ;;  %s685_s2 = inlined_call_operand.vmem [shape: f32[1,32], index: 2, kind: input, shape index: {}]   ;;  %s686_s3 = inlined_call_operand.hbm [shape: f32[32,32], index: 3, kind: input, shape index: {}]   ;;  %s687_s4 = inlined_call_operand.vmem [shape: f32[1,32], index: 4, kind: input, shape index: {}]   ;;  %s688_s5 = inlined_call_operand.hbm [shape: f32[32,32], index: 5, kind: input, shape index: {}]   ;;  %s689_s6 = inlined_call_operand.vmem [shape: f32[1,32], index: 6, kind: input, shape index: {}]   ;;  %s690_s7 = inlined_call_operand.vmem [shape: f32[1,32], index: 7, kind: input, shape index: {}]   ;;  %s691_s8 = inlined_call_operand.<no memory space> [shape: f32[1,1], index: 8, kind: input, shape index: {}]   ;;  %s692_s9 = inlined_call_operand.vmem [shape: f32[8,1], index: 9, kind: output, shape index: {}]  }
   0x1   :  { %v14_v0 = vstv %s691_s8 }
   0x2   :  { %15 = vst [vmem:[#allocation2] sm:$0x1] %v14_v0 }
   0x3   :  { %16 = vsyncpa [#allocation4], 0 }
   0x4   :  { %17 = vsyncpa [#allocation6], 0 }
   0x5   :  { %18 = vsyncpa [#allocation9], 0  ;;  %s543_s11 = smov [#allocation5]   ;;  %s449_s15 = scalar_lea.hbm %s684_s1, 256 }
   0x6   :  { %s34_s12 = sshll.u32 %s543_s11, 4  ;;  %p450_p0 = scmp.ne.s32.totalorder %s684_s1, %s449_s15  ;;  %s35_s12 = int_to_ptr.vmem [resolvable:$true] %s34_s12 }
   0x7   :  { %p453_p1 = scmp.lt.u32.totalorder %s449_s15, %s684_s1 }
   0x9   :  { %p455_p2 = pnand %p453_p1, %p450_p0 }
   0xb   :  { %458 = shalt.err (!%p455_p2)
}
   0xc   :  { %s459_s8 = scalar_lea.vmem %s35_s12, 256  ;;  %p464_p4 = scmp.lt.s32.totalorder %s35_s12, %s35_s12 }
   0xd   :  { %p460_p3 = scmp.ne.s32.totalorder %s35_s12, %s459_s8  ;;  %p465_p5 = scmp.lt.s32.totalorder %s459_s8, %s459_s8 }
   0xf   :  { %p466_p6 = por %p465_p5, %p464_p4 }
  0x11   :  { %p467_p7 = pnand %p466_p6, %p460_p3 }
  0x13   :  { %470 = shalt.err (!%p467_p7)
}
  0x14   :  { %s544_s20 = smov 128   ;;  %s545_s21 = smov 8  }
  0x15   :  { %40 = dma.hbm_to_vmem [thread:$0]  %s684_s1, 256, %s35_s12, [#allocation6], %s544_s20, %s544_s20, %s545_s21  }
  0x16   :  { %s546_s24 = smov [#allocation3]   ;;  %s547_s26 = smov [#allocation7]  }
  0x17   :  { %s25_s25 = sshll.u32 %s546_s24, 4  ;;  %s48_s27 = sshll.u32 %s547_s26, 4  ;;  %s26_s25 = int_to_ptr.vmem [resolvable:$true] %s25_s25  ;;  %s49_s27 = int_to_ptr.vmem [resolvable:$true] %s48_s27 }
  0x18   :  { %s471_s30 = scalar_lea.hbm %s683_s0, 128 }
  0x19   :  { %p472_p8 = scmp.ne.s32.totalorder %s683_s0, %s471_s30  ;;  %p475_p9 = scmp.lt.u32.totalorder %s471_s30, %s683_s0 }
  0x1b   :  { %p477_p10 = pnand %p475_p9, %p472_p8 }
  0x1d   :  { %480 = shalt.err (!%p477_p10)
}
  0x1e   :  { %s481_s1 = scalar_lea.vmem %s26_s25, 128  ;;  %p486_p12 = scmp.lt.s32.totalorder %s26_s25, %s26_s25 }
  0x1f   :  { %p482_p11 = scmp.ne.s32.totalorder %s26_s25, %s481_s1  ;;  %p487_p13 = scmp.lt.s32.totalorder %s481_s1, %s481_s1 }
  0x21   :  { %p488_p0 = por %p487_p13, %p486_p12 }
  0x23   :  { %p489_p1 = pnand %p488_p0, %p482_p11 }
  0x25   :  { %492 = shalt.err (!%p489_p1)
}
  0x26   :  { %28 = dma.hbm_to_vmem [thread:$0]  %s683_s0, 128, %s26_s25, [#allocation4]  }
  0x27   :  { %s493_s18 = scalar_lea.hbm %s686_s3, 512 }
  0x28   :  { %p494_p2 = scmp.ne.s32.totalorder %s686_s3, %s493_s18  ;;  %p497_p3 = scmp.lt.u32.totalorder %s493_s18, %s686_s3 }
  0x2a   :  { %p499_p4 = pnand %p497_p3, %p494_p2 }
  0x2c   :  { %502 = shalt.err (!%p499_p4)
}
  0x2d   :  { %s503_s24 = scalar_lea.vmem %s49_s27, 512  ;;  %p508_p6 = scmp.lt.s32.totalorder %s49_s27, %s49_s27 }
  0x2e   :  { %p504_p5 = scmp.ne.s32.totalorder %s49_s27, %s503_s24  ;;  %p509_p7 = scmp.lt.s32.totalorder %s503_s24, %s503_s24 }
  0x30   :  { %p510_p8 = por %p509_p7, %p508_p6 }
  0x32   :  { %p511_p9 = pnand %p510_p8, %p504_p5 }
  0x34   :  { %514 = shalt.err (!%p511_p9)
}
  0x35   :  { %54 = dma.hbm_to_vmem [thread:$0]  %s686_s3, 512, %s49_s27, [#allocation6], %s544_s20, %s544_s20, %s545_s21  }
  0x36   :  { %s548_s26 = smov [#allocation8]   ;;  %s515_s10 = scalar_lea.hbm %s688_s5, 512 }
  0x37   :  { %s62_s28 = sshll.u32 %s548_s26, 4  ;;  %p516_p10 = scmp.ne.s32.totalorder %s688_s5, %s515_s10  ;;  %s63_s28 = int_to_ptr.vmem [resolvable:$true] %s62_s28 }
  0x38   :  { %p519_p11 = scmp.lt.u32.totalorder %s515_s10, %s688_s5 }
  0x3a   :  { %p521_p12 = pnand %p519_p11, %p516_p10 }
  0x3c   :  { %524 = shalt.err (!%p521_p12)
}
  0x3d   :  { %s525_s12 = scalar_lea.vmem %s63_s28, 512  ;;  %p530_p0 = scmp.lt.s32.totalorder %s63_s28, %s63_s28 }
  0x3e   :  { %p526_p13 = scmp.ne.s32.totalorder %s63_s28, %s525_s12  ;;  %p531_p1 = scmp.lt.s32.totalorder %s525_s12, %s525_s12 }
  0x40   :  { %p532_p2 = por %p531_p1, %p530_p0 }
  0x42   :  { %p533_p3 = pnand %p532_p2, %p526_p13 }
  0x44   :  { %536 = shalt.err (!%p533_p3)
}
  0x45   :  { %68 = dma.hbm_to_vmem [thread:$0]  %s688_s5, 512, %s63_s28, [#allocation9], %s544_s20, %s544_s20, %s545_s21  }
  0x46   :  { %537 = dma.done.wait [#allocation4], 128  }
  0x47   :  { %538 = vsyncadd [#allocation4], 4294967168 }
  0x48   :  { %539 = dma.done.wait [#allocation6], 768  }
  0x49   :  { %540 = vsyncadd [#allocation6], 4294966528 }
  0x4a   :  { %541 = dma.done.wait [#allocation9], 512  }
  0x4b   :  { %542 = vsyncadd [#allocation9], 4294966784  ;;  %v549_v1 = vmov 0.0|0.0   ;;  %vm550_vm0 = vmmov 0   ;;  %v551_v2 = vmov 0.0   ;;  %v88_v3 = vld [vmem:[#allocation5] sm:$0xff] }
  0x4c   :  { %425 = vmatprep.subr.bf16.mxu0 %v549_v1  ;;  %400 = vmatprep.mubr.msk.f32.mxu0 %vm550_vm0, %v551_v2  ;;  %v89_v4 = vld [vmem:[#allocation5 + $0x8] sm:$0xff]  ;;  %v172_v6 = vld [vmem:[#allocation7] sm:$0xff]  ;;  %v173_v7 = vld [vmem:[#allocation7 + $0x8] sm:$0xff]  ;;  %vm97_vm1 = vcmask 130048   ;;  %vm183_vm2 = vcmask 261120   ;;  %vm366_vm3 = vcmask 7168  }
  0x4d   :  { %428 = vmatprep.subr.bf16.mxu1 %v549_v1  ;;  %411 = vmatprep.mubr.msk.f32.mxu1 %vm550_vm0, %v551_v2  ;;  %v426_v5 = vpack.c.bf16 %v89_v4, %v88_v3  ;;  %v429_v8 = vpack.c.bf16 %v173_v7, %v172_v6  ;;  %v87_v9 = vld [vmem:[#allocation3] sm:$0xff]  ;;  %v174_v10 = vld [vmem:[#allocation7 + $0x10] sm:$0xff]  ;;  %v175_v11 = vld [vmem:[#allocation7 + $0x18] sm:$0xff] }
  0x4e   :  { %v432_v12 = vpack.c.bf16 %v175_v11, %v174_v10  ;;  %v258_v13 = vld [vmem:[#allocation8] sm:$0xff]  ;;  %v259_v14 = vld [vmem:[#allocation8 + $0x8] sm:$0xff]  ;;  %v260_v21 = vld [vmem:[#allocation8 + $0x10] sm:$0xff] }
  0x4f   :  { %427 = vmatpush3.bf16.msra.mxu0 %v426_v5  ;;  %430 = vmatpush3.bf16.msra.mxu1 %v429_v8  ;;  %v435_v15 = vpack.c.bf16 %v259_v14, %v258_v13  ;;  %v375_v16 = vld [vmem:[%s685_s2] ss:$0 sm:$0xff]  ;;  %v261_v22 = vld [vmem:[#allocation8 + $0x18] sm:$0xff] }
  0x50   :  { %434 = vmatprep.subr.bf16.mxu0 %v549_v1  ;;  %431 = vmatprep.subr.bf16.mxu1 %v549_v1  ;;  %v438_v23 = vpack.c.bf16 %v261_v22, %v260_v21  ;;  %v377_v24 = vld [vmem:[%s687_s4] ss:$0 sm:$0xff] }
  0x51   :  { %v379_v29 = vld [vmem:[%s689_s6] ss:$0 sm:$0xff] }
  0x52   :  { %401 = vmatmul.mubr.msk.f32.vlgmr.msra.gmra.mrb[0].mxu0 %vm97_vm1, %v87_v9  ;;  %v381_v37 = vld [vmem:[%s690_s7] ss:$0 sm:$0xff] }
  0x53   :  { %422 = vmatprep.mubr.msk.f32.mxu0 %vm550_vm0, %v551_v2  ;;  %433 = vmatpush3.bf16.msra.mxu1 %v432_v12  ;;  %v382_v41 = vld [vmem:[#allocation2] ss:$0 sm:$0xff] }
  0x54   :  { %436 = vmatpush3.bf16.msra.mxu0 %v435_v15 }
  0x55   :  { %437 = vmatprep.subr.bf16.mxu0 %v549_v1 }
  0x58   :  { %439 = vmatpush3.bf16.msra.mxu0 %v438_v23 }
 0x125   :  { %v167_v17 = vpop.f32.mrb[0].mxu0 }
 0x126   :  { %v168_v18 = vadd.f32 %v375_v16, %v167_v17  ;;  %v402_v19 = vpop.f32.mrb[1].mxu0 }
 0x128   :  { %v171_v20 = vmax.f32 %v168_v18, 0.0 }
 0x12a   :  { %412 = vmatmul.mubr.msk.f32.vlgmr.msra.gmra.mrb[0].mxu1 %vm183_vm2, %v171_v20 }
 0x1fd   :  { %v253_v25 = vpop.f32.mrb[0].mxu1 }
 0x1fe   :  { %v254_v26 = vadd.f32 %v377_v24, %v253_v25  ;;  %v413_v27 = vpop.f32.mrb[1].mxu1 }
 0x200   :  { %v257_v28 = vmax.f32 %v254_v26, 0.0 }
 0x202   :  { %423 = vmatmul.mubr.msk.f32.vlgmr.msra.gmra.mrb[2].mxu0 %vm183_vm2, %v257_v28 }
 0x2d5   :  { %v338_v30 = vpop.f32.mrb[2].mxu0 }
 0x2d6   :  { %v339_v31 = vadd.f32 %v379_v29, %v338_v30  ;;  %v424_v32 = vpop.f32.mrb[3].mxu0 }
 0x2d8   :  { %v342_v33 = vadd.f32 3.0, %v339_v31 }
 0x2da   :  { %v343_v34 = vmax.f32 %v342_v33, 0.0 }
 0x2dc   :  { %v344_v35 = vmin.f32 %v343_v34, 6.0 }
 0x2de   :  { %v345_v36 = vmul.f32 %v344_v35, %v339_v31 }
 0x2e0   :  { %v346_v38 = vmul.f32 0.16666667, %v345_v36 }
 0x2e2   :  { %v354_v39 = vmul.f32 %v381_v37, %v346_v38 }
 0x2e4   :  { %v355_v40 = vsel %vm183_vm2, %v354_v39, 0.0 }
 0x2e5   :  { %356 = vadd.xlane.f32.xlu0 %v355_v40 }
 0x372   :  { %v357_v42 = vpop.xlane.xlu0 %356 }
 0x373   :  { %v365_v43 = vadd.f32 %v382_v41, %v357_v42 }
 0x375   :  { %367 = vst.msk [vmem:[%s692_s9] sm:$0xff] %vm366_vm3, %v365_v43 }
 0x376   :  { %372 = vsyncpa [#allocation4], 1 }
 0x377   :  { %373 = vsyncpa [#allocation6], 1 }
 0x378   :  { %374 = vsyncpa [#allocation9], 1 }

</bundles_post_ra>
